<compile_context>
chip_gen: v7x
topology: tpu7x:2x2x1
jax: 0.10.0
libtpu: 0.0.40
codegen_flags: <defaults>
</compile_context>

<pallas_src>
import jax
import jax.numpy as jnp
from jax.experimental import pallas as pl
from jax.experimental.pallas import tpu as pltpu

LANES = 128
SUBLANES = 8          # f32 accumulator sublane grouping (output is always f32)
SMOOTH = 1e-5
PAD_LOGIT = -100.0    # sigmoid(-100) == log1p(exp(-100)) == 0 in f32 -> inert


def _round_up(x, m):
    return ((x + m - 1) // m) * m


def _sublane_multiple(dtype):
    # 8 rows for 4-byte dtypes, 16 for bf16/f16, 32 for int8/fp8.
    return max(SUBLANES, 32 // max(1, jnp.dtype(dtype).itemsize))


def _chip_config():
    """(max_tile_rows, num_shards, vmem_limit_bytes) per TPU generation."""
    try:
        kind = jax.devices()[0].device_kind.lower()
    except Exception:
        kind = ""
    if "v7" in kind or "7x" in kind:
        # 8192x128 f32 block = 4 MiB; 2 streams x 2 buffers = 16 MiB live.
        return 8192, 2, 48 * 1024 * 1024
    if "v6" in kind:
        return 4096, 1, 64 * 1024 * 1024
    if "v5" in kind:
        return 4096, 1, 64 * 1024 * 1024
    # Unknown / older chip: stay conservative and keep the default VMEM limit.
    return 1024, 1, None


def _make_kernel(tile_rows, tiles_per_shard, total_rows, has_partial):
    """Accumulates [bce_sum, intersection, sum(pred), sum(true)] as four
    (8,128) vector accumulators living in the VMEM-resident output block."""

    def kernel(pred_ref, true_ref, out_ref):
        j = pl.program_id(1)

        @pl.when(j == 0)
        def _():
            out_ref[...] = jnp.zeros_like(out_ref)

        def accumulate(mask_rows):
            x = pred_ref[...].astype(jnp.float32)   # logits
            z = true_ref[...].astype(jnp.float32)   # targets

            if mask_rows:
                # Rows past total_rows belong to a partial/out-of-range block:
                # force them to the inert padding values (0 contribution).
                row_off = (pl.program_id(0) * tiles_per_shard + j) * tile_rows
                rid = jax.lax.broadcasted_iota(jnp.int32, x.shape, 0) + row_off
                valid = rid < total_rows
                x = jnp.where(valid, x, PAD_LOGIT)
                z = jnp.where(valid, z, 0.0)

            # Stable BCE-with-logits and sigmoid sharing one exp per element:
            #   bce        = max(x,0) - x*z + log1p(exp(-|x|))
            #   sigmoid(x) = 1/(1+e) if x >= 0, e/(1+e) if x < 0,  e = exp(-|x|)
            e = jnp.exp(-jnp.abs(x))
            bce = jnp.maximum(x, 0.0) - x * z + jnp.log1p(e)
            d = 1.0 + e
            inv = pl.reciprocal(d, approx=True)      # EUP slot
            inv = inv * (2.0 - d * inv)              # one Newton step -> ~2^-24
            p = jnp.where(x >= 0.0, inv, e * inv)

            r, l = x.shape

            def fold(v):  # (tile_rows,128) -> (8,128): pure vreg adds
                return jnp.sum(v.reshape(r // SUBLANES, SUBLANES, l), axis=0)

            out_ref[0, 0:8, :] += fold(bce)
            out_ref[0, 8:16, :] += fold(p * z)
            out_ref[0, 16:24, :] += fold(p)
            out_ref[0, 24:32, :] += fold(z)

        if has_partial:
            row_off = (pl.program_id(0) * tiles_per_shard + j) * tile_rows
            is_partial = row_off + tile_rows > total_rows

            @pl.when(jnp.logical_not(is_partial))
            def _():
                accumulate(False)

            @pl.when(is_partial)
            def _():
                accumulate(True)
        else:
            accumulate(False)

    return kernel


def bce_dice_loss(y_pred, y_true):
    """Pallas implementation of BCEDiceLoss.forward. Returns an f32 scalar."""
    n_valid = y_pred.size
    sub_mult = max(_sublane_multiple(y_pred.dtype), _sublane_multiple(y_true.dtype))
    max_tile_rows, num_shards, vmem_limit = _chip_config()

    pred = jnp.ravel(y_pred)              # native dtype, free reshape
    true = jnp.ravel(y_true)

    rows = max(pl.cdiv(n_valid, LANES), sub_mult)
    n_pad = rows * LANES - n_valid
    if n_pad:
        # TODO(synk): this pad materializes one extra HBM copy of both streams;
        # it is only hit when numel % 128 != 0 (or numel < one minimal tile).
        # A fully copy-free path for that case would need 1-D BlockSpecs or
        # manual DMA.  Padding values are inert for every accumulated sum.
        pred = jnp.pad(pred, (0, n_pad), constant_values=PAD_LOGIT)
        true = jnp.pad(true, (0, n_pad), constant_values=0)

    tile_rows = min(max_tile_rows, _round_up(pl.cdiv(rows, num_shards), sub_mult))
    if tile_rows > rows:                  # never let a block exceed the array
        tile_rows = (rows // sub_mult) * sub_mult
    tiles_total = pl.cdiv(rows, tile_rows)
    tiles_per_shard = pl.cdiv(tiles_total, num_shards)
    has_partial = (num_shards * tiles_per_shard * tile_rows) != rows

    pred2d = pred.reshape(rows, LANES)    # free (bitcast-style) reshape
    true2d = true.reshape(rows, LANES)

    last_block = tiles_total - 1
    if num_shards * tiles_per_shard > tiles_total:
        # Extra grid steps re-read the last tile; the in-kernel row mask
        # zeroes their contribution.
        def idx(s, j):
            return (jnp.minimum(s * tiles_per_shard + j, last_block), 0)
    else:
        def idx(s, j):
            return (s * tiles_per_shard + j, 0)

    in_spec = pl.BlockSpec((tile_rows, LANES), idx)
    out_spec = pl.BlockSpec((1, 4 * SUBLANES, LANES), lambda s, j: (s, 0, 0))

    kernel = _make_kernel(tile_rows, tiles_per_shard, rows, has_partial)

    n_kernel = rows * LANES
    cost = pl.CostEstimate(
        flops=16 * n_kernel,
        transcendentals=3 * n_kernel,     # exp, log1p, approx-recip
        bytes_accessed=int(pred2d.size * pred2d.dtype.itemsize
                           + true2d.size * true2d.dtype.itemsize
                           + num_shards * 4 * SUBLANES * LANES * 4))

    partial = pl.pallas_call(
        kernel,
        out_shape=jax.ShapeDtypeStruct((num_shards, 4 * SUBLANES, LANES),
                                       jnp.float32),
        grid_spec=pltpu.PrefetchScalarGridSpec(
            num_scalar_prefetch=0,
            grid=(num_shards, tiles_per_shard),
            in_specs=[in_spec, in_spec],
            out_specs=out_spec,
        ),
        compiler_params=pltpu.CompilerParams(
            # TODO(synk): on v7x, verify the shard axis is actually split across
            # both TensorCores; if not, switch it to pltpu.CORE_PARALLEL.
            dimension_semantics=("parallel", "arbitrary"),
            vmem_limit_bytes=vmem_limit),
        cost_estimate=cost,
    )(pred2d, true2d)

    # Tiny epilogue in plain JAX: 4 cross-lane reductions + scalar combine.
    sums = jnp.sum(partial.reshape(num_shards, 4, SUBLANES, LANES),
                   axis=(0, 2, 3))        # [bce_sum, intersection, sum_p, sum_t]
    bce_mean = sums[0] / n_valid
    dice = (2.0 * sums[1] + SMOOTH) / (sums[2] + sums[3] + SMOOTH)
    return 0.5 * bce_mean + (1.0 - dice)


def _reference(y_pred, y_true):
    """Pure-JAX reference mirroring the PyTorch module."""
    x = y_pred.astype(jnp.float32)
    z = y_true.astype(jnp.float32)
    bce = jnp.mean(jnp.maximum(x, 0.0) - x * z + jnp.log1p(jnp.exp(-jnp.abs(x))))
    p = jax.nn.sigmoid(x).ravel()
    t = z.ravel()
    intersection = jnp.sum(p * t)
    denominator = jnp.sum(p) + jnp.sum(t)
    dice = (2.0 * intersection + SMOOTH) / (denominator + SMOOTH)
    return 0.5 * bce + (1.0 - dice)


if __name__ == "__main__":
    key = jax.random.PRNGKey(0)
    k1, k2 = jax.random.split(key)
    # NCHW, matching PyTorch conv-style tensors.
    shape = (2, 4, 16, 16)
    y_pred = jax.random.normal(k1, shape, dtype=jnp.float32)            # logits
    y_true = (jax.random.uniform(k2, shape) > 0.5).astype(jnp.float32)  # {0,1}

    loss = jax.block_until_ready(bce_dice_loss(y_pred, y_true))
    ref = jax.block_until_ready(_reference(y_pred, y_true))

    assert jnp.allclose(loss, ref, rtol=1e-5, atol=1e-5), (loss, ref)
    print("KERNEL_OK")
</pallas_src>

<mosaic_0001>
module attributes {stable_mosaic.version = 11 : i64} {
  func.func @kernel(%arg0: i32, %arg1: i32, %arg2: memref<16x128xf32, #tpu.memory_space<vmem>>, %arg3: memref<16x128xf32, #tpu.memory_space<vmem>>, %arg4: memref<1x32x128xf32, #tpu.memory_space<vmem>>) attributes {dimension_semantics = [#tpu.dimension_semantics<parallel>, #tpu.dimension_semantics<arbitrary>], iteration_bounds = array<i64: 1, 1>, scalar_prefetch = 0 : i64, scratch_operands = 0 : i64, tpu.core_type = #tpu.core_type<tc>, window_params = [{transform_indices = @transform_0, window_bounds = array<i64: 16, 128>}, {transform_indices = @transform_1, window_bounds = array<i64: 16, 128>}, {transform_indices = @transform_2, window_bounds = array<i64: 1, 32, 128>}]} {
    %c0_i32 = arith.constant 0 : i32
    %0 = arith.cmpi eq, %arg1, %c0_i32 : i32
    %1 = arith.extui %0 : i1 to i32
    %c0_i32_0 = arith.constant 0 : i32
    %2 = arith.cmpi ne, %1, %c0_i32_0 : i32
    scf.if %2 {
      %cst_33 = arith.constant 0.000000e+00 : f32
      %59 = vector.broadcast %cst_33 : f32 to vector<1x32x128xf32>
      %c0_34 = arith.constant 0 : index
      %c0_35 = arith.constant 0 : index
      %c0_36 = arith.constant 0 : index
      %60 = vector.load %arg4[%c0_34, %c0_35, %c0_36] : memref<1x32x128xf32, #tpu.memory_space<vmem>>, vector<1x32x128xf32>
      tpu.vector_store %arg4[%c0_34, %c0_35, %c0_36], %59 {strides = array<i32>} : memref<1x32x128xf32, #tpu.memory_space<vmem>>, vector<1x32x128xf32>,
    } else {
    }
    %c0 = arith.constant 0 : index
    %c0_1 = arith.constant 0 : index
    %3 = vector.load %arg2[%c0, %c0_1] : memref<16x128xf32, #tpu.memory_space<vmem>>, vector<16x128xf32>
    %c0_2 = arith.constant 0 : index
    %c0_3 = arith.constant 0 : index
    %4 = vector.load %arg3[%c0_2, %c0_3] : memref<16x128xf32, #tpu.memory_space<vmem>>, vector<16x128xf32>
    %5 = math.absf %3 : vector<16x128xf32>
    %cst = arith.constant 0.000000e+00 : f32
    %6 = vector.broadcast %cst : f32 to vector<16x128xf32>
    %7 = arith.subf %6, %5 : vector<16x128xf32>
    %8 = math.exp %7 : vector<16x128xf32>
    %cst_4 = arith.constant 0.000000e+00 : f32
    %9 = vector.broadcast %cst_4 : f32 to vector<16x128xf32>
    %10 = arith.maximumf %3, %9 : vector<16x128xf32>
    %11 = arith.mulf %3, %4 : vector<16x128xf32>
    %12 = arith.subf %10, %11 : vector<16x128xf32>
    %13 = math.log1p %8 : vector<16x128xf32>
    %14 = arith.addf %12, %13 : vector<16x128xf32>
    %cst_5 = arith.constant 1.000000e+00 : f32
    %15 = vector.broadcast %cst_5 : f32 to vector<16x128xf32>
    %16 = arith.addf %15, %8 : vector<16x128xf32>
    %17 = tpu.reciprocal %16 {approx = true} : vector<16x128xf32> -> vector<16x128xf32>
    %18 = arith.mulf %16, %17 : vector<16x128xf32>
    %cst_6 = arith.constant 2.000000e+00 : f32
    %19 = vector.broadcast %cst_6 : f32 to vector<16x128xf32>
    %20 = arith.subf %19, %18 : vector<16x128xf32>
    %21 = arith.mulf %17, %20 : vector<16x128xf32>
    %cst_7 = arith.constant 0.000000e+00 : f32
    %22 = vector.broadcast %cst_7 : f32 to vector<16x128xf32>
    %23 = arith.cmpf oge, %3, %22 : vector<16x128xf32>
    %24 = arith.mulf %8, %21 : vector<16x128xf32>
    %25 = arith.select %23, %21, %24 : vector<16x128xi1>, vector<16x128xf32>
    %c0_8 = arith.constant 0 : index
    %c0_9 = arith.constant 0 : index
    %c0_10 = arith.constant 0 : index
    %26 = vector.load %arg4[%c0_8, %c0_9, %c0_10] : memref<1x32x128xf32, #tpu.memory_space<vmem>>, vector<1x8x128xf32>
    %27 = vector.shape_cast %26 : vector<1x8x128xf32> to vector<8x128xf32>
    %28 = vector.shape_cast %14 : vector<16x128xf32> to vector<2x8x128xf32>
    %cst_11 = arith.constant dense<0.000000e+00> : vector<8x128xf32>
    %29 = vector.multi_reduction <add>, %28, %cst_11 [0] : vector<2x8x128xf32> to vector<8x128xf32>
    %30 = arith.addf %27, %29 : vector<8x128xf32>
    %c0_12 = arith.constant 0 : index
    %c0_13 = arith.constant 0 : index
    %c0_14 = arith.constant 0 : index
    %31 = vector.load %arg4[%c0_12, %c0_13, %c0_14] : memref<1x32x128xf32, #tpu.memory_space<vmem>>, vector<1x8x128xf32>
    %32 = vector.shape_cast %31 : vector<1x8x128xf32> to vector<8x128xf32>
    %33 = vector.shape_cast %30 : vector<8x128xf32> to vector<1x8x128xf32>
    tpu.vector_store %arg4[%c0_12, %c0_13, %c0_14], %33 {strides = array<i32>} : memref<1x32x128xf32, #tpu.memory_space<vmem>>, vector<1x8x128xf32>,
    %c0_15 = arith.constant 0 : index
    %c8 = arith.constant 8 : index
    %c0_16 = arith.constant 0 : index
    %34 = vector.load %arg4[%c0_15, %c8, %c0_16] : memref<1x32x128xf32, #tpu.memory_space<vmem>>, vector<1x8x128xf32>
    %35 = vector.shape_cast %34 : vector<1x8x128xf32> to vector<8x128xf32>
    %36 = arith.mulf %25, %4 : vector<16x128xf32>
    %37 = vector.shape_cast %36 : vector<16x128xf32> to vector<2x8x128xf32>
    %cst_17 = arith.constant dense<0.000000e+00> : vector<8x128xf32>
    %38 = vector.multi_reduction <add>, %37, %cst_17 [0] : vector<2x8x128xf32> to vector<8x128xf32>
    %39 = arith.addf %35, %38 : vector<8x128xf32>
    %c0_18 = arith.constant 0 : index
    %c8_19 = arith.constant 8 : index
    %c0_20 = arith.constant 0 : index
    %40 = vector.load %arg4[%c0_18, %c8_19, %c0_20] : memref<1x32x128xf32, #tpu.memory_space<vmem>>, vector<1x8x128xf32>
    %41 = vector.shape_cast %40 : vector<1x8x128xf32> to vector<8x128xf32>
    %42 = vector.shape_cast %39 : vector<8x128xf32> to vector<1x8x128xf32>
    tpu.vector_store %arg4[%c0_18, %c8_19, %c0_20], %42 {strides = array<i32>} : memref<1x32x128xf32, #tpu.memory_space<vmem>>, vector<1x8x128xf32>,
    %c0_21 = arith.constant 0 : index
    %c16 = arith.constant 16 : index
    %c0_22 = arith.constant 0 : index
    %43 = vector.load %arg4[%c0_21, %c16, %c0_22] : memref<1x32x128xf32, #tpu.memory_space<vmem>>, vector<1x8x128xf32>
    %44 = vector.shape_cast %43 : vector<1x8x128xf32> to vector<8x128xf32>
    %45 = vector.shape_cast %25 : vector<16x128xf32> to vector<2x8x128xf32>
    %cst_23 = arith.constant dense<0.000000e+00> : vector<8x128xf32>
    %46 = vector.multi_reduction <add>, %45, %cst_23 [0] : vector<2x8x128xf32> to vector<8x128xf32>
    %47 = arith.addf %44, %46 : vector<8x128xf32>
    %c0_24 = arith.constant 0 : index
    %c16_25 = arith.constant 16 : index
    %c0_26 = arith.constant 0 : index
    %48 = vector.load %arg4[%c0_24, %c16_25, %c0_26] : memref<1x32x128xf32, #tpu.memory_space<vmem>>, vector<1x8x128xf32>
    %49 = vector.shape_cast %48 : vector<1x8x128xf32> to vector<8x128xf32>
    %50 = vector.shape_cast %47 : vector<8x128xf32> to vector<1x8x128xf32>
    tpu.vector_store %arg4[%c0_24, %c16_25, %c0_26], %50 {strides = array<i32>} : memref<1x32x128xf32, #tpu.memory_space<vmem>>, vector<1x8x128xf32>,
    %c0_27 = arith.constant 0 : index
    %c24 = arith.constant 24 : index
    %c0_28 = arith.constant 0 : index
    %51 = vector.load %arg4[%c0_27, %c24, %c0_28] : memref<1x32x128xf32, #tpu.memory_space<vmem>>, vector<1x8x128xf32>
    %52 = vector.shape_cast %51 : vector<1x8x128xf32> to vector<8x128xf32>
    %53 = vector.shape_cast %4 : vector<16x128xf32> to vector<2x8x128xf32>
    %cst_29 = arith.constant dense<0.000000e+00> : vector<8x128xf32>
    %54 = vector.multi_reduction <add>, %53, %cst_29 [0] : vector<2x8x128xf32> to vector<8x128xf32>
    %55 = arith.addf %52, %54 : vector<8x128xf32>
    %c0_30 = arith.constant 0 : index
    %c24_31 = arith.constant 24 : index
    %c0_32 = arith.constant 0 : index
    %56 = vector.load %arg4[%c0_30, %c24_31, %c0_32] : memref<1x32x128xf32, #tpu.memory_space<vmem>>, vector<1x8x128xf32>
    %57 = vector.shape_cast %56 : vector<1x8x128xf32> to vector<8x128xf32>
    %58 = vector.shape_cast %55 : vector<8x128xf32> to vector<1x8x128xf32>
    tpu.vector_store %arg4[%c0_30, %c24_31, %c0_32], %58 {strides = array<i32>} : memref<1x32x128xf32, #tpu.memory_space<vmem>>, vector<1x8x128xf32>,
    return
  }
  func.func @transform_0(%arg0: i32, %arg1: i32) -> (i32, i32) {
    %c1_i32 = arith.constant 1 : i32
    %0 = arith.muli %arg0, %c1_i32 : i32
    %1 = arith.addi %0, %arg1 : i32
    %c0_i32 = arith.constant 0 : i32
    %c0_i32_0 = arith.constant 0 : i32
    return %1, %c0_i32 : i32, i32
  }
  func.func @transform_1(%arg0: i32, %arg1: i32) -> (i32, i32) {
    %c1_i32 = arith.constant 1 : i32
    %0 = arith.muli %arg0, %c1_i32 : i32
    %1 = arith.addi %0, %arg1 : i32
    %c0_i32 = arith.constant 0 : i32
    %c0_i32_0 = arith.constant 0 : i32
    return %1, %c0_i32 : i32, i32
  }
  func.func @transform_2(%arg0: i32, %arg1: i32) -> (i32, i32, i32) {
    %c0_i32 = arith.constant 0 : i32
    %c0_i32_0 = arith.constant 0 : i32
    %c0_i32_1 = arith.constant 0 : i32
    return %arg0, %c0_i32, %c0_i32_0 : i32, i32, i32
  }
}

</mosaic_0001>

<bundles_post_ra>
// kernel: tpu_custom_call.1
= control target key start
LH: loop header
LB: loop body
LE: loop exit
PB: predicated region body
PF: predicated region fallthrough
CT: control target
= control target key end

     0   :  { %7 = vsyncpa [#allocation3], 0  ;;  %s305_s0 = inlined_call_operand.hbm [shape: f32[16,128], index: 0, kind: input, shape index: {}]   ;;  %s306_s1 = inlined_call_operand.hbm [shape: f32[16,128], index: 1, kind: input, shape index: {}]   ;;  %s307_s2 = inlined_call_operand.hbm [shape: f32[1,32,128], index: 2, kind: output, shape index: {}]  }
   0x1   :  { %8 = vsyncpa [#allocation6], 0 }
   0x2   :  { %9 = vsyncpa [#allocation4], 0  ;;  %s240_s9 = smov [#allocation2]   ;;  %s168_s13 = scalar_lea.hbm %s305_s0, 256 }
   0x3   :  { %s19_s10 = sshll.u32 %s240_s9, 4  ;;  %p169_p0 = scmp.ne.s32.totalorder %s305_s0, %s168_s13  ;;  %s20_s10 = int_to_ptr.vmem [resolvable:$true] %s19_s10 }
   0x4   :  { %p172_p1 = scmp.lt.u32.totalorder %s168_s13, %s305_s0 }
   0x6   :  { %p174_p2 = pnand %p172_p1, %p169_p0 }
   0x8   :  { %177 = shalt.err (!%p174_p2)
}
   0x9   :  { %s178_s18 = scalar_lea.vmem %s20_s10, 256  ;;  %p183_p4 = scmp.lt.s32.totalorder %s20_s10, %s20_s10 }
   0xa   :  { %p179_p3 = scmp.ne.s32.totalorder %s20_s10, %s178_s18  ;;  %p184_p5 = scmp.lt.s32.totalorder %s178_s18, %s178_s18 }
   0xc   :  { %p185_p6 = por %p184_p5, %p183_p4 }
   0xe   :  { %p186_p7 = pnand %p185_p6, %p179_p3 }
  0x10   :  { %189 = shalt.err (!%p186_p7)
}
  0x11   :  { %s241_s19 = smov 128   ;;  %s242_s20 = smov 8  }
  0x12   :  { %25 = dma.hbm_to_vmem [thread:$0]  %s305_s0, 256, %s20_s10, [#allocation3], %s241_s19, %s241_s19, %s242_s20  }
  0x13   :  { %s243_s23 = smov [#allocation5]   ;;  %s190_s27 = scalar_lea.hbm %s306_s1, 256 }
  0x14   :  { %s35_s24 = sshll.u32 %s243_s23, 4  ;;  %p191_p8 = scmp.ne.s32.totalorder %s306_s1, %s190_s27  ;;  %s36_s24 = int_to_ptr.vmem [resolvable:$true] %s35_s24 }
  0x15   :  { %p194_p9 = scmp.lt.u32.totalorder %s190_s27, %s306_s1 }
  0x17   :  { %p196_p10 = pnand %p194_p9, %p191_p8 }
  0x19   :  { %199 = shalt.err (!%p196_p10)
}
  0x1a   :  { %s200_s4 = scalar_lea.vmem %s36_s24, 256  ;;  %p205_p12 = scmp.lt.s32.totalorder %s36_s24, %s36_s24 }
  0x1b   :  { %p201_p11 = scmp.ne.s32.totalorder %s36_s24, %s200_s4  ;;  %p206_p13 = scmp.lt.s32.totalorder %s200_s4, %s200_s4 }
  0x1d   :  { %p207_p0 = por %p206_p13, %p205_p12 }
  0x1f   :  { %p208_p1 = pnand %p207_p0, %p201_p11 }
  0x21   :  { %211 = shalt.err (!%p208_p1)
}
  0x22   :  { %41 = dma.hbm_to_vmem [thread:$0]  %s306_s1, 256, %s36_s24, [#allocation6], %s241_s19, %s241_s19, %s242_s20  }
  0x23   :  { %234 = dma.done.wait [#allocation3], 256  }
  0x24   :  { %235 = vsyncadd [#allocation3], 4294967040 }
  0x25   :  { %236 = dma.done.wait [#allocation6], 256  }
  0x26   :  { %237 = vsyncadd [#allocation6], 4294967040  ;;  %v60_v0 = vld [vmem:[#allocation2] sm:$0xff]  ;;  %v61_v1 = vld [vmem:[#allocation2 + $0x8] sm:$0xff]  ;;  %s244_s1 = smov [#allocation7]  }
  0x27   :  { %v64_v2 = vand.u32 2147483647, %v60_v0  ;;  %v65_v3 = vand.u32 2147483647, %v61_v1  ;;  %v62_v4 = vld [vmem:[#allocation5] sm:$0xff]  ;;  %v63_v5 = vld [vmem:[#allocation5 + $0x8] sm:$0xff] }
  0x28   :  { %v129_v8 = vadd.f32 %v63_v5, %v62_v4  ;;  %v72_v18 = vmax.f32 %v60_v0, 0.0  ;;  %v74_v19 = vmul.f32 %v62_v4, %v60_v0  ;;  %v73_v22 = vmax.f32 %v61_v1, 0.0  ;;  %s137_s6 = sshll.u32 %s244_s1, 4  ;;  %s138_s6 = int_to_ptr.vmem [resolvable:$true] %s137_s6 }
  0x29   :  { %v66_v6 = vsub.f32 0.0, %v64_v2  ;;  %v67_v7 = vsub.f32 0.0, %v65_v3  ;;  %v75_v23 = vmul.f32 %v63_v5, %v61_v1  ;;  %vm108_vm2 = vcmp.ge.f32.partialorder %v60_v0, 0.0  ;;  %s212_s7 = scalar_lea.vmem %s138_s6, 512  ;;  %p217_p3 = scmp.lt.s32.totalorder %s138_s6, %s138_s6 }
  0x2a   :  { %131 = vst [vmem:[#allocation7 + $0x18] sm:$0xff] %v129_v8  ;;  %v76_v27 = vsub.f32 %v72_v18, %v74_v19  ;;  %vm109_vm3 = vcmp.ge.f32.partialorder %v61_v1, 0.0  ;;  %p213_p2 = scmp.ne.s32.totalorder %s138_s6, %s212_s7  ;;  %p218_p4 = scmp.lt.s32.totalorder %s212_s7, %s212_s7 }
  0x2b   :  { %v68_v9 = vmul.f32 1.442695, %v66_v6  ;;  %v70_v10 = vmul.f32 1.442695, %v67_v7  ;;  %v77_v30 = vsub.f32 %v73_v22, %v75_v23 }
  0x2c   :  { %p219_p5 = por %p218_p4, %p217_p3 }
  0x2d   :  { %156 = vpow2.f32 %v68_v9 }
  0x2e   :  { %158 = vpow2.f32 %v70_v10  ;;  %p220_p6 = pnand %p219_p5, %p213_p2 }
  0x37   :  { %v157_v11 = vpop.eup %156 }
  0x38   :  { %v159_v12 = vpop.eup %158  ;;  %v78_v13 = vadd.f32 1.0, %v157_v11  ;;  %v81_v15 = vmul.f32 -0.5, %v157_v11  ;;  %v84_v20 = vand.u32 2147483647, %v157_v11 }
  0x39   :  { %v87_v14 = vadd.f32 1.0, %v159_v12  ;;  %v90_v16 = vmul.f32 -0.5, %v159_v12  ;;  %v93_v24 = vand.u32 2147483647, %v159_v12 }
  0x3a   :  { %160 = vlog2.f32 %v78_v13  ;;  %v82_v17 = vadd.f32 1.0, %v81_v15  ;;  %vm85_vm0 = vcmp.lt.f32.partialorder %v84_v20, 0.0004427343 }
  0x3b   :  { %162 = vlog2.f32 %v87_v14  ;;  %v91_v21 = vadd.f32 1.0, %v90_v16  ;;  %vm94_vm1 = vcmp.lt.f32.partialorder %v93_v24, 0.0004427343 }
  0x3c   :  { %164 = vrcp.f32 %v78_v13  ;;  %v83_v25 = vmul.f32 %v157_v11, %v82_v17 }
  0x3d   :  { %166 = vrcp.f32 %v87_v14  ;;  %v92_v28 = vmul.f32 %v159_v12, %v91_v21 }
  0x44   :  { %v161_v26 = vpop.eup %160 }
  0x45   :  { %v163_v29 = vpop.eup %162  ;;  %v80_v31 = vmul.f32 0.6931472, %v161_v26 }
  0x46   :  { %v165_v32 = vpop.eup %164  ;;  %v89_v33 = vmul.f32 0.6931472, %v163_v29 }
  0x47   :  { %v167_v34 = vpop.eup %166  ;;  %v86_v35 = vsel %vm85_vm0, %v83_v25, %v80_v31  ;;  %v102_v36 = vmul.f32 %v165_v32, %v78_v13 }
  0x48   :  { %v95_v37 = vsel %vm94_vm1, %v92_v28, %v89_v33  ;;  %v96_v38 = vadd.f32 %v86_v35, %v76_v27  ;;  %v103_v39 = vmul.f32 %v167_v34, %v87_v14 }
  0x49   :  { %v97_v40 = vadd.f32 %v95_v37, %v77_v30  ;;  %v104_v41 = vsub.f32 2.0, %v102_v36 }
  0x4a   :  { %v105_v42 = vsub.f32 2.0, %v103_v39 }
  0x4b   :  { %v115_v43 = vadd.f32 %v97_v40, %v96_v38  ;;  %v106_v44 = vmul.f32 %v165_v32, %v104_v41 }
  0x4c   :  { %v107_v45 = vmul.f32 %v167_v34, %v105_v42 }
  0x4d   :  { %v110_v46 = vmul.f32 %v157_v11, %v106_v44  ;;  %117 = vst [vmem:[#allocation7] sm:$0xff] %v115_v43 }
  0x4e   :  { %v111_v47 = vmul.f32 %v159_v12, %v107_v45 }
  0x4f   :  { %v112_v48 = vsel %vm108_vm2, %v106_v44, %v110_v46 }
  0x50   :  { %v113_v49 = vsel %vm109_vm3, %v107_v45, %v111_v47  ;;  %v119_v50 = vmul.f32 %v112_v48, %v62_v4 }
  0x51   :  { %v120_v51 = vmul.f32 %v113_v49, %v63_v5  ;;  %v125_v52 = vadd.f32 %v113_v49, %v112_v48 }
  0x53   :  { %v121_v53 = vadd.f32 %v120_v51, %v119_v50  ;;  %127 = vst [vmem:[#allocation7 + $0x10] sm:$0xff] %v125_v52 }
  0x55   :  { %123 = vst [vmem:[#allocation7 + $0x8] sm:$0xff] %v121_v53 }
  0x56   :  { %223 = shalt.err (!%p220_p6)
}
  0x57   :  { %s224_s10 = scalar_lea.hbm %s307_s2, 512 }
  0x58   :  { %p225_p7 = scmp.ne.s32.totalorder %s307_s2, %s224_s10  ;;  %p228_p8 = scmp.lt.u32.totalorder %s224_s10, %s307_s2 }
  0x5a   :  { %p230_p9 = pnand %p228_p8, %p225_p7 }
  0x5c   :  { %233 = shalt.err (!%p230_p9)
}
  0x5d   :  { %143 = dma.vmem_to_hbm [thread:$0]  %s138_s6, 512, %s307_s2, [#allocation4], %s241_s19, %s241_s19, %s242_s20  }
  0x5e   :  { %238 = dma.done.wait [#allocation4], 512  }
  0x5f   :  { %239 = vsyncadd [#allocation4], 4294966784 }
  0x60   :  { %147 = vsyncpa [#allocation3], 1 }
  0x61   :  { %148 = vsyncpa [#allocation6], 1 }
  0x62   :  { %149 = vsyncpa [#allocation4], 1 }

</bundles_post_ra>
